<compile_context>
chip_gen: v7x
topology: tpu7x:2x2x1
jax: 0.10.0
libtpu: 0.0.40
codegen_flags: <defaults>
</compile_context>

<pallas_src>
import functools

import jax
import jax.numpy as jnp
from jax import lax
from jax.experimental import pallas as pl
from jax.experimental.pallas import tpu as pltpu

_BN_EPS = 1e-5
_LEAKY_SLOPE = 0.2
# Above this resident-x size, drop its double buffer (constant index map -> the second
# buffer is pure waste); below it the default pipelined path costs nothing.
_SINGLE_BUFFER_X_BYTES = 1 << 20


def _round_up(x, m):
    return (x + m - 1) // m * m


def _pick_block_c():
    """128-wide output tiles on v5e (4x128x128 MXU); 256-wide on v6e/v7x (2x256x256)."""
    try:
        kind = jax.devices()[0].device_kind.lower()
    except Exception:
        return 128
    if any(t in kind for t in ("v2", "v3", "v4", "v5")):
        return 128
    return 256


def _dis_kernel(x_ref, w_ref, gamma_ref, beta_ref, o_ref, *,
                n_actual, pad_rows, block_c, num_blocks):
    """One block_c-wide block of output features.

    x_ref     : [N_pad, C_pad] bf16  (resident across the feature grid; matmul LHS,
                                      also the source of the residual slice)
    w_ref     : [C_pad, BC]    bf16  (pre-transposed W columns for this block)
    gamma/beta: [1, BC]        f32
    o_ref     : [N_pad, BC]    f32
    """
    # Linear.  Bias omitted: it cancels exactly under train-mode BatchNorm.
    h = jnp.dot(x_ref[...], w_ref[...], preferred_element_type=jnp.float32)  # [N_pad, BC] f32

    # BatchNorm1d, training mode (biased variance), all f32.
    # Padded batch rows of x are zero -> their h rows are zero, so the mean sum is exact;
    # their contribution to sum((h - mean)^2) is exactly pad_rows * mean^2 and is
    # subtracted below (centered two-pass variance, more robust than E[h^2] - mean^2).
    inv_n = jnp.float32(1.0 / n_actual)
    mean = jnp.sum(h, axis=0, keepdims=True) * inv_n                       # [1, BC]
    d = h - mean
    var = (jnp.sum(d * d, axis=0, keepdims=True)
           - jnp.float32(pad_rows) * mean * mean) * inv_n
    var = jnp.maximum(var, 0.0)
    h_bn = d * lax.rsqrt(var + _BN_EPS) * gamma_ref[...] + beta_ref[...]

    # LeakyReLU(0.2).
    h_act = jnp.where(h_bn >= 0.0, h_bn, _LEAKY_SLOPE * h_bn)

    # Residual: slice this block's feature columns from the already-resident x block
    # (no second HBM DMA of x).  Slice start is a multiple of 128 -> lane-aligned.
    if num_blocks == 1:
        x_res = x_ref[...]
    else:
        col0 = pl.multiple_of(pl.program_id(0) * block_c, 128)
        x_res = x_ref[:, pl.ds(col0, block_c)]
    o_ref[...] = (x_res.astype(jnp.float32) + h_act).astype(o_ref.dtype)


def dis_module_forward(x, w, b, gamma, beta, *, block_c=None):
    """DisModule forward: x + LeakyReLU_0.2(BN_train(Linear(x))).

    x: [N, C] f32; w: [C, C] (PyTorch [out, in] layout); b/gamma/beta: [C].
    `b` is accepted for API parity but cancels exactly under training-mode BatchNorm,
    so the kernel never reads it (NOTE: this elision is only valid while BN runs in
    training mode).  Matmul uses bf16 operands with f32 accumulation (~1e-2 rel. error
    vs f32 PyTorch).  N == 1 diverges from PyTorch (which raises in train mode).
    """
    del b
    n, c = x.shape
    if block_c is None:
        block_c = _pick_block_c()
    n_pad = _round_up(n, 16)            # bf16 sublane packing: (16, 128) tiles
    c_pad = _round_up(c, block_c)       # lane-dense feature axis
    num_blocks = c_pad // block_c

    # Pre-cast MXU operands to bf16 ONCE (not per grid step) and pre-transpose W to
    # [in, out] so the in-kernel contraction is plain (m,k)@(k,n).
    x_bf = jnp.pad(x, ((0, n_pad - n), (0, c_pad - c))).astype(jnp.bfloat16)
    w_t = jnp.pad(w.T, ((0, c_pad - c), (0, c_pad - c))).astype(jnp.bfloat16)
    g_p = jnp.pad(gamma, (0, c_pad - c)).reshape(1, c_pad).astype(jnp.float32)
    bt_p = jnp.pad(beta, (0, c_pad - c)).reshape(1, c_pad).astype(jnp.float32)

    x_bytes = n_pad * c_pad * 2
    single_buf_x = x_bytes > _SINGLE_BUFFER_X_BYTES
    x_mode = pl.Buffered(1) if single_buf_x else None   # constant index map -> 1 buffer

    # Explicit VMEM budget sized to the actual buffers (default scoped limit is only
    # 16 MiB on v5e, 32 MiB on v6e/v7x; budget is per-TensorCore on v7x).
    vmem_bytes = (
        (1 if single_buf_x else 2) * x_bytes        # resident bf16 x
        + 2 * c_pad * block_c * 2                   # double-buffered bf16 W tile
        + 2 * n_pad * block_c * 4                   # double-buffered f32 out tile
        + 6 * n_pad * block_c * 4                   # h / BN temporaries headroom
        + 8 * block_c * 4)                          # gamma/beta/mean/var rows
    vmem_limit = int(min(max(2 * vmem_bytes, 16 * 1024 * 1024), 48 * 1024 * 1024))

    flops = 2 * n_pad * c_pad * c_pad
    bytes_accessed = x_bytes + c_pad * c_pad * 2 + n_pad * c_pad * 4 + 2 * c_pad * 4

    # TODO(synk): for large N*C (hit first on v7x's 64 MiB VMEM / 32 MiB scoped and
    # v5e's 16 MiB scoped) switch to a two-phase streaming structure: grid over
    # (feature block, batch tile), accumulate per-feature sum/sumsq in scratch with
    # pl.when init/finalize, then normalize + LeakyReLU + residual per batch tile.
    kernel = functools.partial(_dis_kernel, n_actual=n, pad_rows=n_pad - n,
                               block_c=block_c, num_blocks=num_blocks)

    out = pl.pallas_call(
        kernel,
        out_shape=jax.ShapeDtypeStruct((n_pad, c_pad), x.dtype),
        grid=(num_blocks,),
        in_specs=[
            # Resident bf16 x: matmul LHS + in-kernel residual slice.
            pl.BlockSpec((n_pad, c_pad), lambda j: (0, 0), pipeline_mode=x_mode),
            # Pre-transposed W columns for feature block j.
            pl.BlockSpec((c_pad, block_c), lambda j: (0, j)),
            pl.BlockSpec((1, block_c), lambda j: (0, j)),    # gamma
            pl.BlockSpec((1, block_c), lambda j: (0, j)),    # beta
        ],
        out_specs=pl.BlockSpec((n_pad, block_c), lambda j: (0, j)),
        compiler_params=pltpu.CompilerParams(
            # Feature blocks are independent (BN stats are per-feature).
            dimension_semantics=("parallel",),
            vmem_limit_bytes=vmem_limit),
        cost_estimate=pl.CostEstimate(
            flops=flops, transcendentals=0, bytes_accessed=bytes_accessed),
    )(x_bf, w_t, g_p, bt_p)

    return out[:n, :c]


if __name__ == "__main__":
    key = jax.random.PRNGKey(0)
    kx, kw, kb = jax.random.split(key, 3)

    N, C = 8, 32  # batch=8, channels=32

    x = jax.random.normal(kx, (N, C), dtype=jnp.float32)

    # Deterministic parameter init (mimicking PyTorch Linear's uniform range).
    bound = 1.0 / jnp.sqrt(jnp.float32(C))
    w = jax.random.uniform(kw, (C, C), jnp.float32, -bound, bound)   # [out, in]
    b = jax.random.uniform(kb, (C,), jnp.float32, -bound, bound)
    gamma = jnp.ones((C,), jnp.float32)    # BatchNorm1d weight init
    beta = jnp.zeros((C,), jnp.float32)    # BatchNorm1d bias init

    out = dis_module_forward(x, w, b, gamma, beta)
    jax.block_until_ready(out)

    # Plain-JAX f32 reference of the exact PyTorch train-mode math (bias included here
    # to demonstrate it cancels).  Tolerance loosened for the bf16 MXU operands /
    # bf16-rounded residual (f32 accumulation + f32 BN/activation math in the kernel).
    h_ref = x @ w.T + b
    mu = h_ref.mean(axis=0, keepdims=True)
    var = ((h_ref - mu) ** 2).mean(axis=0, keepdims=True)
    h_ref = (h_ref - mu) / jnp.sqrt(var + _BN_EPS) * gamma + beta
    h_ref = jnp.where(h_ref >= 0, h_ref, _LEAKY_SLOPE * h_ref)
    ref = x + h_ref
    assert jnp.allclose(out, ref, atol=5e-2, rtol=5e-2), "mismatch vs reference"

    print("KERNEL_OK")
</pallas_src>

<mosaic_0001>
module attributes {stable_mosaic.version = 11 : i64} {
  func.func @_dis_kernel(%arg0: i32, %arg1: memref<16x256xbf16, #tpu.memory_space<vmem>>, %arg2: memref<256x256xbf16, #tpu.memory_space<vmem>>, %arg3: memref<1x256xf32, #tpu.memory_space<vmem>>, %arg4: memref<1x256xf32, #tpu.memory_space<vmem>>, %arg5: memref<16x256xf32, #tpu.memory_space<vmem>>) attributes {dimension_semantics = [#tpu.dimension_semantics<parallel>], iteration_bounds = array<i64: 1>, scalar_prefetch = 0 : i64, scratch_operands = 0 : i64, tpu.core_type = #tpu.core_type<tc>, window_params = [{pipeline_mode = #tpu.pipeline_mode<synchronous>, transform_indices = @transform_0, window_bounds = array<i64: 16, 256>}, {transform_indices = @transform_1, window_bounds = array<i64: 256, 256>}, {transform_indices = @transform_2, window_bounds = array<i64: 1, 256>}, {transform_indices = @transform_3, window_bounds = array<i64: 1, 256>}, {transform_indices = @transform_4, window_bounds = array<i64: 16, 256>}]} {
    %c0 = arith.constant 0 : index
    %c0_0 = arith.constant 0 : index
    %0 = vector.load %arg1[%c0, %c0_0] : memref<16x256xbf16, #tpu.memory_space<vmem>>, vector<16x256xbf16>
    %c0_1 = arith.constant 0 : index
    %c0_2 = arith.constant 0 : index
    %1 = vector.load %arg2[%c0_1, %c0_2] : memref<256x256xbf16, #tpu.memory_space<vmem>>, vector<256x256xbf16>
    %cst = arith.constant dense<0.000000e+00> : vector<16x256xf32>
    %2 = tpu.matmul %0, %1, %cst {dimension_numbers = #tpu.dot_dimension_numbers<[1], [0], [0], [1], [0, 0, 1, 1], [], []>} : vector<16x256xbf16>, vector<256x256xbf16>, vector<16x256xf32> -> vector<16x256xf32>
    %cst_3 = arith.constant dense<0.000000e+00> : vector<256xf32>
    %3 = vector.multi_reduction <add>, %2, %cst_3 [0] : vector<16x256xf32> to vector<256xf32>
    %4 = vector.shape_cast %3 : vector<256xf32> to vector<1x256xf32>
    %cst_4 = arith.constant 1.250000e-01 : f32
    %5 = vector.broadcast %cst_4 : f32 to vector<1x256xf32>
    %6 = arith.mulf %4, %5 : vector<1x256xf32>
    %7 = vector.broadcast %6 : vector<1x256xf32> to vector<16x256xf32>
    %8 = arith.subf %2, %7 : vector<16x256xf32>
    %9 = arith.mulf %8, %8 : vector<16x256xf32>
    %cst_5 = arith.constant dense<0.000000e+00> : vector<256xf32>
    %10 = vector.multi_reduction <add>, %9, %cst_5 [0] : vector<16x256xf32> to vector<256xf32>
    %11 = vector.shape_cast %10 : vector<256xf32> to vector<1x256xf32>
    %cst_6 = arith.constant 8.000000e+00 : f32
    %12 = vector.broadcast %cst_6 : f32 to vector<1x256xf32>
    %13 = arith.mulf %12, %6 : vector<1x256xf32>
    %14 = arith.mulf %13, %6 : vector<1x256xf32>
    %15 = arith.subf %11, %14 : vector<1x256xf32>
    %cst_7 = arith.constant 1.250000e-01 : f32
    %16 = vector.broadcast %cst_7 : f32 to vector<1x256xf32>
    %17 = arith.mulf %15, %16 : vector<1x256xf32>
    %cst_8 = arith.constant 0.000000e+00 : f32
    %18 = vector.broadcast %cst_8 : f32 to vector<1x256xf32>
    %19 = arith.maximumf %17, %18 : vector<1x256xf32>
    %cst_9 = arith.constant 9.99999974E-6 : f32
    %20 = vector.broadcast %cst_9 : f32 to vector<1x256xf32>
    %21 = arith.addf %19, %20 : vector<1x256xf32>
    %22 = math.rsqrt %21 : vector<1x256xf32>
    %23 = vector.broadcast %22 : vector<1x256xf32> to vector<16x256xf32>
    %24 = arith.mulf %8, %23 : vector<16x256xf32>
    %c0_10 = arith.constant 0 : index
    %c0_11 = arith.constant 0 : index
    %25 = vector.load %arg3[%c0_10, %c0_11] : memref<1x256xf32, #tpu.memory_space<vmem>>, vector<1x256xf32>
    %26 = vector.broadcast %25 : vector<1x256xf32> to vector<16x256xf32>
    %27 = arith.mulf %24, %26 : vector<16x256xf32>
    %c0_12 = arith.constant 0 : index
    %c0_13 = arith.constant 0 : index
    %28 = vector.load %arg4[%c0_12, %c0_13] : memref<1x256xf32, #tpu.memory_space<vmem>>, vector<1x256xf32>
    %29 = vector.broadcast %28 : vector<1x256xf32> to vector<16x256xf32>
    %30 = arith.addf %27, %29 : vector<16x256xf32>
    %cst_14 = arith.constant 0.000000e+00 : f32
    %31 = vector.broadcast %cst_14 : f32 to vector<16x256xf32>
    %32 = arith.cmpf oge, %30, %31 : vector<16x256xf32>
    %cst_15 = arith.constant 2.000000e-01 : f32
    %33 = vector.broadcast %cst_15 : f32 to vector<16x256xf32>
    %34 = arith.mulf %33, %30 : vector<16x256xf32>
    %35 = arith.select %32, %30, %34 : vector<16x256xi1>, vector<16x256xf32>
    %c0_16 = arith.constant 0 : index
    %c0_17 = arith.constant 0 : index
    %36 = vector.load %arg1[%c0_16, %c0_17] : memref<16x256xbf16, #tpu.memory_space<vmem>>, vector<16x256xbf16>
    %37 = arith.extf %36 : vector<16x256xbf16> to vector<16x256xf32>
    %38 = arith.addf %37, %35 : vector<16x256xf32>
    %c0_18 = arith.constant 0 : index
    %c0_19 = arith.constant 0 : index
    %39 = vector.load %arg5[%c0_18, %c0_19] : memref<16x256xf32, #tpu.memory_space<vmem>>, vector<16x256xf32>
    tpu.vector_store %arg5[%c0_18, %c0_19], %38 {strides = array<i32>} : memref<16x256xf32, #tpu.memory_space<vmem>>, vector<16x256xf32>,
    return
  }
  func.func @transform_0(%arg0: i32) -> (i32, i32) {
    %c0_i32 = arith.constant 0 : i32
    %c0_i32_0 = arith.constant 0 : i32
    %c0_i32_1 = arith.constant 0 : i32
    return %c0_i32, %c0_i32_0 : i32, i32
  }
  func.func @transform_1(%arg0: i32) -> (i32, i32) {
    %c0_i32 = arith.constant 0 : i32
    %c0_i32_0 = arith.constant 0 : i32
    return %c0_i32, %arg0 : i32, i32
  }
  func.func @transform_2(%arg0: i32) -> (i32, i32) {
    %c0_i32 = arith.constant 0 : i32
    %c0_i32_0 = arith.constant 0 : i32
    return %c0_i32, %arg0 : i32, i32
  }
  func.func @transform_3(%arg0: i32) -> (i32, i32) {
    %c0_i32 = arith.constant 0 : i32
    %c0_i32_0 = arith.constant 0 : i32
    return %c0_i32, %arg0 : i32, i32
  }
  func.func @transform_4(%arg0: i32) -> (i32, i32) {
    %c0_i32 = arith.constant 0 : i32
    %c0_i32_0 = arith.constant 0 : i32
    return %c0_i32, %arg0 : i32, i32
  }
}

</mosaic_0001>

<bundles_post_ra>
// kernel: tpu_custom_call.1
= control target key start
LH: loop header
LB: loop body
LE: loop exit
PB: predicated region body
PF: predicated region fallthrough
CT: control target
= control target key end

     0   :  { %9 = vsyncpa [#allocation3], 0  ;;  %s676_s0 = inlined_call_operand.hbm [shape: bf16[16,256], index: 0, kind: input, shape index: {}]   ;;  %s677_s1 = inlined_call_operand.hbm [shape: bf16[256,256], index: 1, kind: input, shape index: {}]   ;;  %s678_s2 = inlined_call_operand.vmem [shape: f32[1,256], index: 2, kind: input, shape index: {}]   ;;  %s679_s3 = inlined_call_operand.vmem [shape: f32[1,256], index: 3, kind: input, shape index: {}]   ;;  %s680_s4 = inlined_call_operand.hbm [shape: f32[16,256], index: 4, kind: output, shape index: {}]  }
   0x1   :  { %10 = vsyncpa [#allocation6], 0 }
   0x2   :  { %11 = vsyncpa [#allocation4], 0  ;;  %s590_s15 = smov [#allocation2]   ;;  %s518_s19 = scalar_lea.hbm %s676_s0, 256 }
   0x3   :  { %s17_s16 = sshll.u32 %s590_s15, 4  ;;  %p519_p0 = scmp.ne.s32.totalorder %s676_s0, %s518_s19  ;;  %s18_s16 = int_to_ptr.vmem [resolvable:$true] %s17_s16 }
   0x4   :  { %p522_p1 = scmp.lt.u32.totalorder %s518_s19, %s676_s0 }
   0x6   :  { %p524_p2 = pnand %p522_p1, %p519_p0 }
   0x8   :  { %527 = shalt.err (!%p524_p2)
}
   0x9   :  { %s528_s24 = scalar_lea.vmem %s18_s16, 256  ;;  %p533_p4 = scmp.lt.s32.totalorder %s18_s16, %s18_s16 }
   0xa   :  { %p529_p3 = scmp.ne.s32.totalorder %s18_s16, %s528_s24  ;;  %p534_p5 = scmp.lt.s32.totalorder %s528_s24, %s528_s24 }
   0xc   :  { %p535_p6 = por %p534_p5, %p533_p4 }
   0xe   :  { %p536_p7 = pnand %p535_p6, %p529_p3 }
  0x10   :  { %539 = shalt.err (!%p536_p7)
}
  0x11   :  { %s591_s25 = smov 128   ;;  %s592_s26 = smov 8  }
  0x12   :  { %23 = dma.hbm_to_vmem [thread:$0]  %s676_s0, 256, %s18_s16, [#allocation3], %s591_s25, %s591_s25, %s592_s26  }
  0x13   :  { %s593_s29 = smov [#allocation5]   ;;  %s540_s7 = scalar_lea.hbm %s677_s1, 4096 }
  0x14   :  { %s29_s30 = sshll.u32 %s593_s29, 4  ;;  %p541_p8 = scmp.ne.s32.totalorder %s677_s1, %s540_s7  ;;  %s30_s30 = int_to_ptr.vmem [resolvable:$true] %s29_s30 }
  0x15   :  { %p544_p9 = scmp.lt.u32.totalorder %s540_s7, %s677_s1 }
  0x17   :  { %p546_p10 = pnand %p544_p9, %p541_p8 }
  0x19   :  { %549 = shalt.err (!%p546_p10)
}
  0x1a   :  { %s550_s12 = scalar_lea.vmem %s30_s30, 4096  ;;  %p555_p12 = scmp.lt.s32.totalorder %s30_s30, %s30_s30 }
  0x1b   :  { %p551_p11 = scmp.ne.s32.totalorder %s30_s30, %s550_s12  ;;  %p556_p13 = scmp.lt.s32.totalorder %s550_s12, %s550_s12 }
  0x1d   :  { %p557_p0 = por %p556_p13, %p555_p12 }
  0x1f   :  { %p558_p1 = pnand %p557_p0, %p551_p11 }
  0x21   :  { %561 = shalt.err (!%p558_p1)
}
  0x22   :  { %35 = dma.hbm_to_vmem [thread:$0]  %s677_s1, 4096, %s30_s30, [#allocation6], %s591_s25, %s591_s25, %s592_s26  }
  0x23   :  { %584 = dma.done.wait [#allocation3], 256  }
  0x24   :  { %585 = vsyncadd [#allocation3], 4294967040 }
  0x25   :  { %586 = dma.done.wait [#allocation6], 4096  }
  0x26   :  { %587 = vsyncadd [#allocation6], 4294963200  ;;  %v464_v0 = vld [vmem:[#allocation5 + $0x4] ss:$8 sps:$4 sm:$0xff]   ;;  %v466_v1 = vld [vmem:[#allocation5] ss:$8 sps:$4 sm:$0xff]  }
  0x27   :  { %250 = vmatprep.subr.bf16.mxu0 %v464_v0  ;;  %v467_v2 = vld [vmem:[#allocation5 + $0x14] ss:$8 sps:$4 sm:$0xff]   ;;  %v469_v3 = vld [vmem:[#allocation5 + $0x10] ss:$8 sps:$4 sm:$0xff]   ;;  %v470_v4 = vld [vmem:[#allocation5 + $0x24] ss:$8 sps:$4 sm:$0xff]  }
  0x28   :  { %251 = vmatpush1.bf16.msra.mxu0 %v466_v1  ;;  %v472_v5 = vld [vmem:[#allocation5 + $0x20] ss:$8 sps:$4 sm:$0xff]   ;;  %v473_v6 = vld [vmem:[#allocation5 + $0x34] ss:$8 sps:$4 sm:$0xff]   ;;  %v475_v7 = vld [vmem:[#allocation5 + $0x30] ss:$8 sps:$4 sm:$0xff]  }
  0x29   :  { %252 = vmatprep.subr.bf16.mxu0 %v467_v2  ;;  %v476_v8 = vld [vmem:[#allocation5 + $0x44] ss:$8 sps:$4 sm:$0xff]   ;;  %v478_v9 = vld [vmem:[#allocation5 + $0x40] ss:$8 sps:$4 sm:$0xff]   ;;  %v479_v10 = vld [vmem:[#allocation5 + $0x54] ss:$8 sps:$4 sm:$0xff]  }
  0x2a   :  { %v481_v11 = vld [vmem:[#allocation5 + $0x50] ss:$8 sps:$4 sm:$0xff]   ;;  %v482_v12 = vld [vmem:[#allocation5 + $0x64] ss:$8 sps:$4 sm:$0xff]   ;;  %v484_v16 = vld [vmem:[#allocation5 + $0x60] ss:$8 sps:$4 sm:$0xff]  }
  0x2b   :  { %v646_v13 = vld [vmem:[#allocation2] sm:$0xff]  ;;  %v648_v14 = vld [vmem:[#allocation2 + $0x8] sm:$0xff]  ;;  %v488_v19 = vld [vmem:[#allocation5 + $0x84] ss:$8 sps:$4 sm:$0xff]  }
  0x2c   :  { %253 = vmatpush1.bf16.msra.mxu0 %v469_v3  ;;  %v424_v15 = vcombine.high %v646_v13, %v648_v14  ;;  %v485_v17 = vld [vmem:[#allocation5 + $0x74] ss:$8 sps:$4 sm:$0xff]   ;;  %v487_v18 = vld [vmem:[#allocation5 + $0x70] ss:$8 sps:$4 sm:$0xff]   ;;  %v490_v20 = vld [vmem:[#allocation5 + $0x80] ss:$8 sps:$4 sm:$0xff]   ;;  %v423_v35 = vcombine.low %v646_v13, %v648_v14 }
  0x2d   :  { %254 = vmatprep.subr.bf16.mxu0 %v470_v4  ;;  %v491_v21 = vld [vmem:[#allocation5 + $0x94] ss:$8 sps:$4 sm:$0xff]   ;;  %v493_v22 = vld [vmem:[#allocation5 + $0x90] ss:$8 sps:$4 sm:$0xff]   ;;  %v494_v23 = vld [vmem:[#allocation5 + $0xa4] ss:$8 sps:$4 sm:$0xff]  }
  0x2e   :  { %282 = vmatprep.mubr.bf16.mxu0 %v424_v15  ;;  %v496_v24 = vld [vmem:[#allocation5 + $0xa0] ss:$8 sps:$4 sm:$0xff]   ;;  %v497_v25 = vld [vmem:[#allocation5 + $0xb4] ss:$8 sps:$4 sm:$0xff]   ;;  %v499_v26 = vld [vmem:[#allocation5 + $0xb0] ss:$8 sps:$4 sm:$0xff]  }
  0x2f   :  { %v500_v27 = vld [vmem:[#allocation5 + $0xc4] ss:$8 sps:$4 sm:$0xff]   ;;  %v502_v28 = vld [vmem:[#allocation5 + $0xc0] ss:$8 sps:$4 sm:$0xff]   ;;  %v503_v29 = vld [vmem:[#allocation5 + $0xd4] ss:$8 sps:$4 sm:$0xff]  }
  0x30   :  { %255 = vmatpush1.bf16.msra.mxu0 %v472_v5  ;;  %v505_v30 = vld [vmem:[#allocation5 + $0xd0] ss:$8 sps:$4 sm:$0xff]   ;;  %v506_v31 = vld [vmem:[#allocation5 + $0xe4] ss:$8 sps:$4 sm:$0xff]   ;;  %v508_v32 = vld [vmem:[#allocation5 + $0xe0] ss:$8 sps:$4 sm:$0xff]  }
  0x31   :  { %256 = vmatprep.subr.bf16.mxu0 %v473_v6  ;;  %v509_v33 = vld [vmem:[#allocation5 + $0xf4] ss:$8 sps:$4 sm:$0xff]   ;;  %v511_v34 = vld [vmem:[#allocation5 + $0xf0] ss:$8 sps:$4 sm:$0xff]  }
  0x34   :  { %257 = vmatpush1.bf16.msra.mxu0 %v475_v7 }
  0x35   :  { %258 = vmatprep.subr.bf16.mxu0 %v476_v8 }
  0x38   :  { %259 = vmatpush1.bf16.msra.mxu0 %v478_v9 }
  0x39   :  { %260 = vmatprep.subr.bf16.mxu0 %v479_v10 }
  0x3c   :  { %261 = vmatpush1.bf16.msra.mxu0 %v481_v11 }
  0x3d   :  { %262 = vmatprep.subr.bf16.mxu0 %v482_v12 }
  0x40   :  { %263 = vmatpush1.bf16.msra.mxu0 %v484_v16 }
  0x41   :  { %264 = vmatprep.subr.bf16.mxu0 %v485_v17 }
  0x44   :  { %265 = vmatpush1.bf16.msra.mxu0 %v487_v18 }
  0x45   :  { %266 = vmatprep.subr.bf16.mxu0 %v488_v19 }
  0x48   :  { %267 = vmatpush1.bf16.msra.mxu0 %v490_v20 }
  0x49   :  { %268 = vmatprep.subr.bf16.mxu0 %v491_v21 }
  0x4c   :  { %269 = vmatpush1.bf16.msra.mxu0 %v493_v22 }
  0x4d   :  { %270 = vmatprep.subr.bf16.mxu0 %v494_v23 }
  0x50   :  { %271 = vmatpush1.bf16.msra.mxu0 %v496_v24 }
  0x51   :  { %272 = vmatprep.subr.bf16.mxu0 %v497_v25  ;;  %v351_v25 = vlaneseq }
  0x54   :  { %273 = vmatpush1.bf16.msra.mxu0 %v499_v26 }
  0x55   :  { %274 = vmatprep.subr.bf16.mxu0 %v500_v27 }
  0x58   :  { %275 = vmatpush1.bf16.msra.mxu0 %v502_v28 }
  0x59   :  { %276 = vmatprep.subr.bf16.mxu0 %v503_v29  ;;  %v352_v29 = vshrl.u32 %v351_v25, 7 }
  0x5c   :  { %277 = vmatpush1.bf16.msra.mxu0 %v505_v30  ;;  %v353_v30 = vsub.s32 0, %v352_v29 }
  0x5d   :  { %278 = vmatprep.subr.bf16.mxu0 %v506_v31  ;;  %v349_v31 = vld [vmem:[%s678_s2] sm:$0x3]  ;;  %s594_s2 = smov [#allocation7]  }
  0x60   :  { %279 = vmatpush1.bf16.msra.mxu0 %v508_v32  ;;  %v357_v32 = vsub.s32 1, %v352_v29 }
  0x61   :  { %280 = vmatprep.subr.bf16.mxu0 %v509_v33  ;;  %v365_v33 = vld [vmem:[%s679_s3] sm:$0x3]  ;;  %s410_s3 = sshll.u32 %s594_s2, 4  ;;  %s411_s3 = int_to_ptr.vmem [resolvable:$true] %s410_s3 }
  0x62   :  { %s562_s17 = scalar_lea.vmem %s411_s3, 512  ;;  %p567_p3 = scmp.lt.s32.totalorder %s411_s3, %s411_s3 }
  0x63   :  { %p563_p2 = scmp.ne.s32.totalorder %s411_s3, %s562_s17  ;;  %p568_p4 = scmp.lt.s32.totalorder %s562_s17, %s562_s17 }
  0x64   :  { %281 = vmatpush1.bf16.msra.mxu0 %v511_v34  ;;  %v354_v34 = vrot.slane %v349_v31, %v353_v30 }
  0x65   :  { %p569_p5 = por %p568_p4, %p567_p3 }
  0x67   :  { %283 = vmatmul.mubr.bf16.vlgmr.msra.gmra.mrb[0].mxu0 %v423_v35  ;;  %p570_p6 = pnand %p569_p5, %p563_p2 }
 0x13a   :  { %v284_v36 = vpop.f32.mrb[0].mxu0 }
 0x13b   :  { %v286_v37 = vpop.f32.mrb[1].mxu0 }
 0x13c   :  { %v288_v38 = vpop.f32.mrb[2].mxu0 }
 0x13d   :  { %v293_v39 = vadd.f32 %v288_v38, %v284_v36  ;;  %v290_v40 = vpop.f32.mrb[3].mxu0 }
 0x13e   :  { %v300_v41 = vadd.f32 %v290_v40, %v286_v37 }
 0x13f   :  { %v294_v42 = vrot.slane %v293_v39, 4 }
 0x140   :  { %v301_v43 = vrot.slane %v300_v41, 4 }
 0x141   :  { %v295_v44 = vadd.f32 %v294_v42, %v293_v39 }
 0x142   :  { %v302_v45 = vadd.f32 %v301_v43, %v300_v41  ;;  %v374_v43 = vrot.slane %v365_v33, %v357_v32 }
 0x143   :  { %v296_v46 = vrot.slane %v295_v44, 2 }
 0x144   :  { %v303_v47 = vrot.slane %v302_v45, 2 }
 0x145   :  { %v297_v48 = vadd.f32 %v296_v46, %v295_v44 }
 0x146   :  { %v304_v49 = vadd.f32 %v303_v47, %v302_v45 }
 0x147   :  { %v298_v50 = vrot.slane %v297_v48, 1 }
 0x148   :  { %v305_v51 = vrot.slane %v304_v49, 1 }
 0x149   :  { %v299_v52 = vadd.f32 %v298_v50, %v297_v48  ;;  %v393_v48 = vunpack.c.l.bf16 %v646_v13 }
 0x14a   :  { %v306_v53 = vadd.f32 %v305_v51, %v304_v49  ;;  %v394_v49 = vunpack.c.h.bf16 %v646_v13 }
 0x14b   :  { %v307_v54 = vmul.f32 0.125, %v299_v52  ;;  %v395_v52 = vunpack.c.l.bf16 %v648_v14 }
 0x14c   :  { %v308_v55 = vmul.f32 0.125, %v306_v53  ;;  %v396_v53 = vunpack.c.h.bf16 %v648_v14 }
 0x14d   :  { %v309_v56 = vsub.f32 %v284_v36, %v307_v54  ;;  %v311_v57 = vsub.f32 %v288_v38, %v307_v54  ;;  %v331_v9 = vmul.f32 8.0, %v307_v54  ;;  %v358_v36 = vrot.slane %v349_v31, %v357_v32 }
 0x14e   :  { %v310_v58 = vsub.f32 %v286_v37, %v308_v55  ;;  %v312_v59 = vsub.f32 %v290_v40, %v308_v55  ;;  %v332_v11 = vmul.f32 8.0, %v308_v55  ;;  %v370_v40 = vrot.slane %v365_v33, %v353_v30 }
 0x14f   :  { %v313_v60 = vmul.f32 %v309_v56, %v309_v56  ;;  %v315_v61 = vmul.f32 %v311_v57, %v311_v57  ;;  %v333_v17 = vmul.f32 %v331_v9, %v307_v54 }
 0x150   :  { %v314_v62 = vmul.f32 %v310_v58, %v310_v58  ;;  %v316_v63 = vmul.f32 %v312_v59, %v312_v59  ;;  %v334_v19 = vmul.f32 %v332_v11, %v308_v55 }
 0x151   :  { %v317_v0 = vadd.f32 %v315_v61, %v313_v60 }
 0x152   :  { %v324_v1 = vadd.f32 %v316_v63, %v314_v62 }
 0x153   :  { %v318_v2 = vrot.slane %v317_v0, 4 }
 0x154   :  { %v325_v3 = vrot.slane %v324_v1, 4 }
 0x155   :  { %v319_v4 = vadd.f32 %v318_v2, %v317_v0 }
 0x156   :  { %v326_v5 = vadd.f32 %v325_v3, %v324_v1 }
 0x157   :  { %v320_v6 = vrot.slane %v319_v4, 2 }
 0x158   :  { %v327_v7 = vrot.slane %v326_v5, 2 }
 0x159   :  { %v321_v8 = vadd.f32 %v320_v6, %v319_v4 }
 0x15a   :  { %v328_v10 = vadd.f32 %v327_v7, %v326_v5 }
 0x15b   :  { %v322_v12 = vrot.slane %v321_v8, 1 }
 0x15c   :  { %v329_v15 = vrot.slane %v328_v10, 1 }
 0x15d   :  { %v323_v16 = vadd.f32 %v322_v12, %v321_v8 }
 0x15e   :  { %v330_v18 = vadd.f32 %v329_v15, %v328_v10 }
 0x15f   :  { %v335_v20 = vsub.f32 %v323_v16, %v333_v17 }
 0x160   :  { %v336_v21 = vsub.f32 %v330_v18, %v334_v19 }
 0x161   :  { %v337_v22 = vmul.f32 0.125, %v335_v20 }
 0x162   :  { %v338_v23 = vmul.f32 0.125, %v336_v21 }
 0x163   :  { %v339_v24 = vmax.f32 %v337_v22, 0.0 }
 0x164   :  { %v340_v26 = vmax.f32 %v338_v23, 0.0 }
 0x165   :  { %v341_v27 = vadd.f32 1e-05, %v339_v24 }
 0x166   :  { %v342_v28 = vadd.f32 1e-05, %v340_v26 }
 0x167   :  { %514 = vrsqrt.f32 %v341_v27 }
 0x168   :  { %516 = vrsqrt.f32 %v342_v28 }
 0x171   :  { %v515_v35 = vpop.eup %514 }
 0x172   :  { %v517_v37 = vpop.eup %516  ;;  %v345_v38 = vmul.f32 %v515_v35, %v309_v56  ;;  %v347_v39 = vmul.f32 %v515_v35, %v311_v57 }
 0x173   :  { %v346_v41 = vmul.f32 %v517_v37, %v310_v58  ;;  %v348_v42 = vmul.f32 %v517_v37, %v312_v59 }
 0x174   :  { %v361_v44 = vmul.f32 %v354_v34, %v345_v38  ;;  %v363_v45 = vmul.f32 %v354_v34, %v347_v39 }
 0x175   :  { %v362_v46 = vmul.f32 %v358_v36, %v346_v41  ;;  %v364_v47 = vmul.f32 %v358_v36, %v348_v42 }
 0x176   :  { %v377_v50 = vadd.f32 %v370_v40, %v361_v44  ;;  %v379_v51 = vadd.f32 %v370_v40, %v363_v45 }
 0x177   :  { %v378_v54 = vadd.f32 %v374_v43, %v362_v46  ;;  %v380_v55 = vadd.f32 %v374_v43, %v364_v47 }
 0x178   :  { %vm381_vm0 = vcmp.ge.f32.partialorder %v377_v50, 0.0  ;;  %vm383_vm1 = vcmp.ge.f32.partialorder %v379_v51, 0.0  ;;  %v385_v56 = vmul.f32 0.2, %v377_v50  ;;  %v387_v57 = vmul.f32 0.2, %v379_v51 }
 0x179   :  { %vm382_vm2 = vcmp.ge.f32.partialorder %v378_v54, 0.0  ;;  %vm384_vm3 = vcmp.ge.f32.partialorder %v380_v55, 0.0  ;;  %v386_v58 = vmul.f32 0.2, %v378_v54  ;;  %v388_v59 = vmul.f32 0.2, %v380_v55 }
 0x17a   :  { %v389_v60 = vsel %vm381_vm0, %v377_v50, %v385_v56  ;;  %v391_v13 = vsel %vm383_vm1, %v379_v51, %v387_v57 }
 0x17b   :  { %v397_v61 = vadd.f32 %v393_v48, %v389_v60  ;;  %v399_v62 = vadd.f32 %v395_v52, %v391_v13  ;;  %v390_v63 = vsel %vm382_vm2, %v378_v54, %v386_v58  ;;  %v392_v0 = vsel %vm384_vm3, %v380_v55, %v388_v59 }
 0x17c   :  { %v398_v14 = vadd.f32 %v394_v49, %v390_v63  ;;  %v400_v1 = vadd.f32 %v396_v53, %v392_v0 }
 0x17d   :  { %403 = vst [vmem:[#allocation7 + $0x10] sm:$0xff] %v399_v62  ;;  %401 = vst [vmem:[#allocation7] sm:$0xff] %v397_v61 }
 0x17e   :  { %404 = vst [vmem:[#allocation7 + $0x18] sm:$0xff] %v400_v1  ;;  %402 = vst [vmem:[#allocation7 + $0x8] sm:$0xff] %v398_v14 }
 0x17f   :  { %573 = shalt.err (!%p570_p6)
}
 0x180   :  { %s574_s20 = scalar_lea.hbm %s680_s4, 512 }
 0x181   :  { %p575_p7 = scmp.ne.s32.totalorder %s680_s4, %s574_s20  ;;  %p578_p8 = scmp.lt.u32.totalorder %s574_s20, %s680_s4 }
 0x183   :  { %p580_p9 = pnand %p578_p8, %p575_p7 }
 0x185   :  { %583 = shalt.err (!%p580_p9)
}
 0x186   :  { %s595_s25 = smov 256   ;;  %s596_s26 = smov 16  }
 0x187   :  { %416 = dma.vmem_to_hbm [thread:$0]  %s411_s3, 512, %s680_s4, [#allocation4], %s595_s25, %s595_s25, %s596_s26  }
 0x188   :  { %588 = dma.done.wait [#allocation4], 512  }
 0x189   :  { %589 = vsyncadd [#allocation4], 4294966784 }
 0x18a   :  { %420 = vsyncpa [#allocation3], 1 }
 0x18b   :  { %421 = vsyncpa [#allocation6], 1 }
 0x18c   :  { %422 = vsyncpa [#allocation4], 1 }

</bundles_post_ra>
